<compile_context>
chip_gen: v5e
topology: v5e:2x2
jax: 0.10.0
libtpu: 0.0.40
codegen_flags: <defaults>
</compile_context>

<pallas_src>
from typing import List, Optional

import jax
import jax.numpy as jnp
from jax.experimental import pallas as pl
from jax.experimental.pallas import tpu as pltpu


_LANE = 128      # vreg lane width
_SUBLANE = 16    # sublane granularity (bf16-packed tiles)


def _round_up(x: int, m: int) -> int:
    return ((x + m - 1) // m) * m


def _mlp_kernel(x_ref, w1_ref, b1_ref, w2_ref, b2_ref,
                w3_ref, b3_ref, w4_ref, b4_ref, out_ref):
    """Fused 4-layer MLP: (Linear+ReLU) x3 -> Linear, all operands resident in VMEM.

    x arrives in f32 and is cast to bf16 on the VPU; matmuls run in bf16 on the MXU
    with f32 accumulation; bias add + ReLU in f32; output written back in bf16.
    """
    cdt = w1_ref.dtype
    x = x_ref[...].astype(cdt)                       # in-kernel cast (no extra HBM pass)
    h = jnp.dot(x, w1_ref[...], preferred_element_type=jnp.float32)
    h = jnp.maximum(h + b1_ref[...], 0.0).astype(cdt)
    h = jnp.dot(h, w2_ref[...], preferred_element_type=jnp.float32)
    h = jnp.maximum(h + b2_ref[...], 0.0).astype(cdt)
    h = jnp.dot(h, w3_ref[...], preferred_element_type=jnp.float32)
    h = jnp.maximum(h + b3_ref[...], 0.0).astype(cdt)
    out = jnp.dot(h, w4_ref[...], preferred_element_type=jnp.float32) + b4_ref[...]
    out_ref[...] = out.astype(out_ref.dtype)


def init_params(key, latent_dim: int, hidden_dims: List[int], n_classes: int,
                extra_feature_dim: int = 0):
    """Deterministic init mimicking nn.Linear's U(-1/sqrt(fan_in), 1/sqrt(fan_in))."""
    dims = [latent_dim + extra_feature_dim] + list(hidden_dims) + [n_classes]
    params = []
    for i in range(len(dims) - 1):
        key, kw, kb = jax.random.split(key, 3)
        fan_in, fan_out = dims[i], dims[i + 1]
        bound = 1.0 / jnp.sqrt(jnp.float32(fan_in))
        w = jax.random.uniform(kw, (fan_in, fan_out), jnp.float32, -bound, bound)
        b = jax.random.uniform(kb, (1, fan_out), jnp.float32, -bound, bound)
        params.append((w, b))
    return params


def simple_discriminator_forward(x: jax.Array,
                                 params,
                                 extra_features: Optional[jax.Array] = None,
                                 batch_labels: Optional[jax.Array] = None,
                                 *, batch_tile: int = 1024,
                                 compute_dtype=jnp.bfloat16):
    # Glue (concatenation along dim=1, like torch.cat(..., dim=1)) in plain JAX.
    if extra_features is not None:
        x = jnp.concatenate([x, extra_features], axis=1)
    if batch_labels is not None:
        x = jnp.concatenate([x, batch_labels], axis=1)
    latents = x                                   # returned as-is (like the PyTorch module)
    x = x.astype(jnp.float32)                     # mirrors `input.float()`

    assert len(params) == 4, "kernel is specialized for 3 hidden layers + output layer"
    (w1, b1), (w2, b2), (w3, b3), (w4, b4) = params
    B, D_in = x.shape
    n_classes = w4.shape[1]

    # --- pad final layer to a lane-dense (multiple of 128) output block ------------
    out_pad = _round_up(max(n_classes, _LANE), _LANE)
    if out_pad != n_classes:
        w4 = jnp.pad(w4, ((0, 0), (0, out_pad - n_classes)))
        b4 = jnp.pad(b4, ((0, 0), (0, out_pad - n_classes)))

    # --- choose batch tile & zero-pad batch -----------------------------------------
    # Large batches: tiles of `batch_tile` (multiple of 256 -> full MXU M-pass groups).
    # Small batches: one grid step covering the whole (sublane-padded) batch.
    batch_tile = max(_round_up(batch_tile, 256), 256)
    if B <= batch_tile:
        tb = _round_up(B, _SUBLANE)
    else:
        tb = batch_tile
    B_pad = _round_up(B, tb)
    if B_pad != B:
        x = jnp.pad(x, ((0, B_pad - B), (0, 0)))
    grid = (B_pad // tb,)

    # Weights in compute dtype (bf16 -> native MXU path); biases stay f32.
    w1c, w2c, w3c, w4c = (w.astype(compute_dtype) for w in (w1, w2, w3, w4))
    b1f, b2f, b3f, b4f = (b.astype(jnp.float32) for b in (b1, b2, b3, b4))

    # --- advisory cost estimate + VMEM budget ---------------------------------------
    dims = [D_in, w1.shape[1], w2.shape[1], w3.shape[1], out_pad]
    flops = 2 * B_pad * sum(dims[i] * dims[i + 1] for i in range(4))
    wdt = jnp.dtype(compute_dtype).itemsize
    bytes_accessed = int(
        B_pad * D_in * 4                                                 # x read (f32)
        + sum(w.size for w in (w1c, w2c, w3c, w4c)) * wdt                # weights (bf16)
        + sum(b.size for b in (b1f, b2f, b3f, b4f)) * 4                  # biases (f32)
        + B_pad * out_pad * wdt)                                         # out write (bf16)
    cost = pl.CostEstimate(flops=int(flops), transcendentals=0,
                           bytes_accessed=bytes_accessed)

    working_set = (
        2 * sum(w.size for w in (w1c, w2c, w3c, w4c)) * wdt              # weights (2 bufs)
        + 2 * sum(8 * b.shape[1] * 4 for b in (b1f, b2f, b3f, b4f))      # biases (sublane-padded)
        + 2 * tb * D_in * 4                                              # double-buffered x tile
        + 2 * tb * out_pad * wdt                                         # double-buffered out tile
        + 2 * tb * max(dims) * (4 + wdt))                                # live intermediates
    vmem_limit = int(min(max(2 * working_set, 8 * 1024 * 1024), 64 * 1024 * 1024))

    def const_spec(shape):
        # Whole (small) parameter array resident in VMEM; constant index map means it
        # is DMA'd once and never re-fetched across grid steps.
        return pl.BlockSpec(shape, lambda i: (0,) * len(shape))

    out = pl.pallas_call(
        _mlp_kernel,
        out_shape=jax.ShapeDtypeStruct((B_pad, out_pad), compute_dtype),
        grid_spec=pltpu.PrefetchScalarGridSpec(
            num_scalar_prefetch=0,
            grid=grid,
            in_specs=[
                pl.BlockSpec((tb, D_in), lambda i: (i, 0)),   # x tile (f32)
                const_spec(w1c.shape), const_spec(b1f.shape),
                const_spec(w2c.shape), const_spec(b2f.shape),
                const_spec(w3c.shape), const_spec(b3f.shape),
                const_spec(w4c.shape), const_spec(b4f.shape),
            ],
            out_specs=pl.BlockSpec((tb, out_pad), lambda i: (i, 0)),
        ),
        compiler_params=pltpu.CompilerParams(
            dimension_semantics=("parallel",),
            vmem_limit_bytes=vmem_limit),
        cost_estimate=cost,
    )(x, w1c, b1f, w2c, b2f, w3c, b3f, w4c, b4f)

    out = out[:B, :n_classes].astype(jnp.float32)
    return {"outputs": out, "latents": latents}


def _reference_forward(x, params, compute_dtype=jnp.bfloat16):
    """Plain-JAX reference mirroring the kernel's bf16-matmul / f32-accumulate math."""
    h = x.astype(jnp.float32)
    n = len(params)
    for i, (w, b) in enumerate(params):
        h = jnp.dot(h.astype(compute_dtype), w.astype(compute_dtype),
                    preferred_element_type=jnp.float32) + b.astype(jnp.float32)
        if i < n - 1:
            h = jnp.maximum(h, 0.0)
    # mirror the kernel's bf16 output writeback
    return h.astype(compute_dtype).astype(jnp.float32)


if __name__ == "__main__":
    # Small shapes consistent with the module: latent_dim=128, 3 hidden layers,
    # n_classes=2, extra_feature_dim=16, batch=8.
    latent_dim = 128
    hidden_dims = [256, 256, 256]
    n_classes = 2
    extra_feature_dim = 16
    batch = 8

    key = jax.random.PRNGKey(0)
    key, kx, ke = jax.random.split(key, 3)
    x = jax.random.normal(kx, (batch, latent_dim), dtype=jnp.float32)
    extra = jax.random.normal(ke, (batch, extra_feature_dim), dtype=jnp.float32)

    params = init_params(key, latent_dim, hidden_dims, n_classes,
                         extra_feature_dim=extra_feature_dim)

    result = simple_discriminator_forward(x, params, extra_features=extra)
    outputs = jax.block_until_ready(result["outputs"])
    latents = jax.block_until_ready(result["latents"])

    ref = _reference_forward(jnp.concatenate([x, extra], axis=1), params)
    assert outputs.shape == (batch, n_classes)
    assert latents.shape == (batch, latent_dim + extra_feature_dim)
    assert jnp.allclose(outputs, ref, atol=1e-2, rtol=1e-2), "mismatch vs reference"

    print("KERNEL_OK")
</pallas_src>

<mosaic_0001>
module attributes {stable_mosaic.version = 11 : i64} {
  func.func @_mlp_kernel(%arg0: i32, %arg1: memref<16x144xf32, #tpu.memory_space<vmem>>, %arg2: memref<144x256xbf16, #tpu.memory_space<vmem>>, %arg3: memref<1x256xf32, #tpu.memory_space<vmem>>, %arg4: memref<256x256xbf16, #tpu.memory_space<vmem>>, %arg5: memref<1x256xf32, #tpu.memory_space<vmem>>, %arg6: memref<256x256xbf16, #tpu.memory_space<vmem>>, %arg7: memref<1x256xf32, #tpu.memory_space<vmem>>, %arg8: memref<256x128xbf16, #tpu.memory_space<vmem>>, %arg9: memref<1x128xf32, #tpu.memory_space<vmem>>, %arg10: memref<16x128xbf16, #tpu.memory_space<vmem>>) attributes {dimension_semantics = [#tpu.dimension_semantics<parallel>], iteration_bounds = array<i64: 1>, scalar_prefetch = 0 : i64, scratch_operands = 0 : i64, tpu.core_type = #tpu.core_type<tc>, window_params = [{transform_indices = @transform_0, window_bounds = array<i64: 16, 144>}, {pipeline_mode = #tpu.pipeline_mode<synchronous>, transform_indices = @transform_1, window_bounds = array<i64: 144, 256>}, {pipeline_mode = #tpu.pipeline_mode<synchronous>, transform_indices = @transform_2, window_bounds = array<i64: 1, 256>}, {pipeline_mode = #tpu.pipeline_mode<synchronous>, transform_indices = @transform_3, window_bounds = array<i64: 256, 256>}, {pipeline_mode = #tpu.pipeline_mode<synchronous>, transform_indices = @transform_4, window_bounds = array<i64: 1, 256>}, {pipeline_mode = #tpu.pipeline_mode<synchronous>, transform_indices = @transform_5, window_bounds = array<i64: 256, 256>}, {pipeline_mode = #tpu.pipeline_mode<synchronous>, transform_indices = @transform_6, window_bounds = array<i64: 1, 256>}, {pipeline_mode = #tpu.pipeline_mode<synchronous>, transform_indices = @transform_7, window_bounds = array<i64: 256, 128>}, {pipeline_mode = #tpu.pipeline_mode<synchronous>, transform_indices = @transform_8, window_bounds = array<i64: 1, 128>}, {transform_indices = @transform_9, window_bounds = array<i64: 16, 128>}]} {
    %c0 = arith.constant 0 : index
    %c0_0 = arith.constant 0 : index
    %0 = vector.load %arg1[%c0, %c0_0] : memref<16x144xf32, #tpu.memory_space<vmem>>, vector<16x144xf32>
    %1 = arith.truncf %0 : vector<16x144xf32> to vector<16x144xbf16>
    %c0_1 = arith.constant 0 : index
    %c0_2 = arith.constant 0 : index
    %2 = vector.load %arg2[%c0_1, %c0_2] : memref<144x256xbf16, #tpu.memory_space<vmem>>, vector<144x256xbf16>
    %cst = arith.constant dense<0.000000e+00> : vector<16x256xf32>
    %3 = tpu.matmul %1, %2, %cst {dimension_numbers = #tpu.dot_dimension_numbers<[1], [0], [0], [1], [0, 0, 1, 1], [], []>} : vector<16x144xbf16>, vector<144x256xbf16>, vector<16x256xf32> -> vector<16x256xf32>
    %c0_3 = arith.constant 0 : index
    %c0_4 = arith.constant 0 : index
    %4 = vector.load %arg3[%c0_3, %c0_4] : memref<1x256xf32, #tpu.memory_space<vmem>>, vector<1x256xf32>
    %5 = vector.broadcast %4 : vector<1x256xf32> to vector<16x256xf32>
    %6 = arith.addf %3, %5 : vector<16x256xf32>
    %cst_5 = arith.constant 0.000000e+00 : f32
    %7 = vector.broadcast %cst_5 : f32 to vector<16x256xf32>
    %8 = arith.maximumf %6, %7 : vector<16x256xf32>
    %9 = arith.truncf %8 : vector<16x256xf32> to vector<16x256xbf16>
    %c0_6 = arith.constant 0 : index
    %c0_7 = arith.constant 0 : index
    %10 = vector.load %arg4[%c0_6, %c0_7] : memref<256x256xbf16, #tpu.memory_space<vmem>>, vector<256x256xbf16>
    %cst_8 = arith.constant dense<0.000000e+00> : vector<16x256xf32>
    %11 = tpu.matmul %9, %10, %cst_8 {dimension_numbers = #tpu.dot_dimension_numbers<[1], [0], [0], [1], [0, 0, 1, 1], [], []>} : vector<16x256xbf16>, vector<256x256xbf16>, vector<16x256xf32> -> vector<16x256xf32>
    %c0_9 = arith.constant 0 : index
    %c0_10 = arith.constant 0 : index
    %12 = vector.load %arg5[%c0_9, %c0_10] : memref<1x256xf32, #tpu.memory_space<vmem>>, vector<1x256xf32>
    %13 = vector.broadcast %12 : vector<1x256xf32> to vector<16x256xf32>
    %14 = arith.addf %11, %13 : vector<16x256xf32>
    %cst_11 = arith.constant 0.000000e+00 : f32
    %15 = vector.broadcast %cst_11 : f32 to vector<16x256xf32>
    %16 = arith.maximumf %14, %15 : vector<16x256xf32>
    %17 = arith.truncf %16 : vector<16x256xf32> to vector<16x256xbf16>
    %c0_12 = arith.constant 0 : index
    %c0_13 = arith.constant 0 : index
    %18 = vector.load %arg6[%c0_12, %c0_13] : memref<256x256xbf16, #tpu.memory_space<vmem>>, vector<256x256xbf16>
    %cst_14 = arith.constant dense<0.000000e+00> : vector<16x256xf32>
    %19 = tpu.matmul %17, %18, %cst_14 {dimension_numbers = #tpu.dot_dimension_numbers<[1], [0], [0], [1], [0, 0, 1, 1], [], []>} : vector<16x256xbf16>, vector<256x256xbf16>, vector<16x256xf32> -> vector<16x256xf32>
    %c0_15 = arith.constant 0 : index
    %c0_16 = arith.constant 0 : index
    %20 = vector.load %arg7[%c0_15, %c0_16] : memref<1x256xf32, #tpu.memory_space<vmem>>, vector<1x256xf32>
    %21 = vector.broadcast %20 : vector<1x256xf32> to vector<16x256xf32>
    %22 = arith.addf %19, %21 : vector<16x256xf32>
    %cst_17 = arith.constant 0.000000e+00 : f32
    %23 = vector.broadcast %cst_17 : f32 to vector<16x256xf32>
    %24 = arith.maximumf %22, %23 : vector<16x256xf32>
    %25 = arith.truncf %24 : vector<16x256xf32> to vector<16x256xbf16>
    %c0_18 = arith.constant 0 : index
    %c0_19 = arith.constant 0 : index
    %26 = vector.load %arg8[%c0_18, %c0_19] : memref<256x128xbf16, #tpu.memory_space<vmem>>, vector<256x128xbf16>
    %cst_20 = arith.constant dense<0.000000e+00> : vector<16x128xf32>
    %27 = tpu.matmul %25, %26, %cst_20 {dimension_numbers = #tpu.dot_dimension_numbers<[1], [0], [0], [1], [0, 0, 1, 1], [], []>} : vector<16x256xbf16>, vector<256x128xbf16>, vector<16x128xf32> -> vector<16x128xf32>
    %c0_21 = arith.constant 0 : index
    %c0_22 = arith.constant 0 : index
    %28 = vector.load %arg9[%c0_21, %c0_22] : memref<1x128xf32, #tpu.memory_space<vmem>>, vector<1x128xf32>
    %29 = vector.broadcast %28 : vector<1x128xf32> to vector<16x128xf32>
    %30 = arith.addf %27, %29 : vector<16x128xf32>
    %31 = arith.truncf %30 : vector<16x128xf32> to vector<16x128xbf16>
    %c0_23 = arith.constant 0 : index
    %c0_24 = arith.constant 0 : index
    %32 = vector.load %arg10[%c0_23, %c0_24] : memref<16x128xbf16, #tpu.memory_space<vmem>>, vector<16x128xbf16>
    tpu.vector_store %arg10[%c0_23, %c0_24], %31 {strides = array<i32>} : memref<16x128xbf16, #tpu.memory_space<vmem>>, vector<16x128xbf16>,
    return
  }
  func.func @transform_0(%arg0: i32) -> (i32, i32) {
    %c0_i32 = arith.constant 0 : i32
    %c0_i32_0 = arith.constant 0 : i32
    return %arg0, %c0_i32 : i32, i32
  }
  func.func @transform_1(%arg0: i32) -> (i32, i32) {
    %c0_i32 = arith.constant 0 : i32
    %c0_i32_0 = arith.constant 0 : i32
    %c0_i32_1 = arith.constant 0 : i32
    return %c0_i32, %c0_i32_0 : i32, i32
  }
  func.func @transform_2(%arg0: i32) -> (i32, i32) {
    %c0_i32 = arith.constant 0 : i32
    %c0_i32_0 = arith.constant 0 : i32
    %c0_i32_1 = arith.constant 0 : i32
    return %c0_i32, %c0_i32_0 : i32, i32
  }
  func.func @transform_3(%arg0: i32) -> (i32, i32) {
    %c0_i32 = arith.constant 0 : i32
    %c0_i32_0 = arith.constant 0 : i32
    %c0_i32_1 = arith.constant 0 : i32
    return %c0_i32, %c0_i32_0 : i32, i32
  }
  func.func @transform_4(%arg0: i32) -> (i32, i32) {
    %c0_i32 = arith.constant 0 : i32
    %c0_i32_0 = arith.constant 0 : i32
    %c0_i32_1 = arith.constant 0 : i32
    return %c0_i32, %c0_i32_0 : i32, i32
  }
  func.func @transform_5(%arg0: i32) -> (i32, i32) {
    %c0_i32 = arith.constant 0 : i32
    %c0_i32_0 = arith.constant 0 : i32
    %c0_i32_1 = arith.constant 0 : i32
    return %c0_i32, %c0_i32_0 : i32, i32
  }
  func.func @transform_6(%arg0: i32) -> (i32, i32) {
    %c0_i32 = arith.constant 0 : i32
    %c0_i32_0 = arith.constant 0 : i32
    %c0_i32_1 = arith.constant 0 : i32
    return %c0_i32, %c0_i32_0 : i32, i32
  }
  func.func @transform_7(%arg0: i32) -> (i32, i32) {
    %c0_i32 = arith.constant 0 : i32
    %c0_i32_0 = arith.constant 0 : i32
    %c0_i32_1 = arith.constant 0 : i32
    return %c0_i32, %c0_i32_0 : i32, i32
  }
  func.func @transform_8(%arg0: i32) -> (i32, i32) {
    %c0_i32 = arith.constant 0 : i32
    %c0_i32_0 = arith.constant 0 : i32
    %c0_i32_1 = arith.constant 0 : i32
    return %c0_i32, %c0_i32_0 : i32, i32
  }
  func.func @transform_9(%arg0: i32) -> (i32, i32) {
    %c0_i32 = arith.constant 0 : i32
    %c0_i32_0 = arith.constant 0 : i32
    return %arg0, %c0_i32 : i32, i32
  }
}

</mosaic_0001>

<bundles_post_ra>
// kernel: tpu_custom_call.1
= control target key start
LH: loop header
LB: loop body
LE: loop exit
PB: predicated region body
PF: predicated region fallthrough
CT: control target
= control target key end

     0   :  { %14 = vsyncpa [#allocation3], 0  ;;  %s1817_s0 = inlined_call_operand.hbm [shape: f32[16,144], index: 0, kind: input, shape index: {}]   ;;  %s1818_s1 = inlined_call_operand.hbm [shape: bf16[144,256], index: 1, kind: input, shape index: {}]   ;;  %s1819_s2 = inlined_call_operand.hbm [shape: f32[1,256], index: 2, kind: input, shape index: {}]   ;;  %s1820_s3 = inlined_call_operand.hbm [shape: bf16[256,256], index: 3, kind: input, shape index: {}]   ;;  %s1821_s4 = inlined_call_operand.vmem [shape: f32[1,256], index: 4, kind: input, shape index: {}]   ;;  %s1822_s5 = inlined_call_operand.hbm [shape: bf16[256,256], index: 5, kind: input, shape index: {}]   ;;  %s1823_s6 = inlined_call_operand.vmem [shape: f32[1,256], index: 6, kind: input, shape index: {}]   ;;  %s1824_s7 = inlined_call_operand.hbm [shape: bf16[256,128], index: 7, kind: input, shape index: {}]   ;;  %s1825_s8 = inlined_call_operand.vmem [shape: f32[1,128], index: 8, kind: input, shape index: {}]   ;;  %s1826_s9 = inlined_call_operand.hbm [shape: bf16[16,128], index: 9, kind: output, shape index: {}]  }
   0x1   :  { %15 = vsyncpa [#allocation6], 0 }
   0x2   :  { %16 = vsyncpa [#allocation9], 0 }
   0x3   :  { %17 = vsyncpa [#allocation12], 0  ;;  %s36_s11 = sshll.u32 %s1818_s1, 4  ;;  %s37_s11 = int_to_ptr.hbm [resolvable:$true] %s36_s11 }
   0x4   :  { %18 = vsyncpa [#allocation4], 0  ;;  %s1707_s12 = smov [#allocation5]   ;;  %s60_s16 = sshll.u32 %s1820_s3, 4  ;;  %s61_s16 = int_to_ptr.hbm [resolvable:$true] %s60_s16 }
   0x5   :  { %s38_s13 = sshll.u32 %s1707_s12, 4  ;;  %s1708_s17 = smov 128   ;;  %s39_s13 = int_to_ptr.vmem [resolvable:$true] %s38_s13 }
   0x6   :  { %s1709_s18 = smov 8   ;;  %s1710_s19 = smov [#allocation8]  }
   0x7   :  { %44 = dma.hbm_to_vmem [thread:$0]  %s37_s11, 2304, %s39_s13, [#allocation6], %s1708_s17, %s1708_s17, %s1709_s18  }
   0x8   :  { %s62_s20 = sshll.u32 %s1710_s19, 4  ;;  %s23_s22 = sshll.u32 %s1817_s0, 4  ;;  %s63_s20 = int_to_ptr.vmem [resolvable:$true] %s62_s20  ;;  %s24_s22 = int_to_ptr.hbm [resolvable:$true] %s23_s22 }
   0x9   :  { %68 = dma.hbm_to_vmem [thread:$0]  %s61_s16, 4096, %s63_s20, [#allocation9], %s1708_s17, %s1708_s17, %s1709_s18  }
   0xa   :  { %s1711_s3 = smov [#allocation2]   ;;  %s50_s26 = sshll.u32 %s1819_s2, 4  ;;  %s51_s26 = int_to_ptr.hbm [resolvable:$true] %s50_s26 }
   0xb   :  { %s25_s23 = sshll.u32 %s1711_s3, 4  ;;  %s1712_s27 = smov 256   ;;  %s26_s23 = int_to_ptr.vmem [resolvable:$true] %s25_s23 }
   0xc   :  { %s1713_s28 = smov 16   ;;  %s1714_s29 = smov [#allocation7]  }
   0xd   :  { %31 = dma.hbm_to_vmem [thread:$0]  %s24_s22, 512, %s26_s23, [#allocation3], %s1712_s27, %s1712_s27, %s1713_s28  }
   0xe   :  { %s52_s30 = sshll.u32 %s1714_s29, 4  ;;  %s75_s11 = sshll.u32 %s1822_s5, 4  ;;  %s53_s30 = int_to_ptr.vmem [resolvable:$true] %s52_s30  ;;  %s76_s11 = int_to_ptr.hbm [resolvable:$true] %s75_s11 }
   0xf   :  { %55 = dma.hbm_to_vmem [thread:$0]  %s51_s26, 32, %s53_s30, [#allocation6]  }
  0x10   :  { %s90_s14 = sshll.u32 %s1824_s7, 4  ;;  %s1715_s15 = smov [#allocation10]   ;;  %s91_s14 = int_to_ptr.hbm [resolvable:$true] %s90_s14 }
  0x11   :  { %s77_s16 = sshll.u32 %s1715_s15, 4  ;;  %s1716_s2 = smov [#allocation11]   ;;  %s78_s16 = int_to_ptr.vmem [resolvable:$true] %s77_s16 }
  0x12   :  { %83 = dma.hbm_to_vmem [thread:$0]  %s76_s11, 4096, %s78_s16, [#allocation9], %s1708_s17, %s1708_s17, %s1709_s18  }
  0x13   :  { %s92_s19 = sshll.u32 %s1716_s2, 4  ;;  %s1717_s20 = smov 64   ;;  %s93_s19 = int_to_ptr.vmem [resolvable:$true] %s92_s19 }
  0x14   :  { %s1718_s5 = smov 4  }
  0x15   :  { %98 = dma.hbm_to_vmem [thread:$0]  %s91_s14, 2048, %s93_s19, [#allocation12], %s1717_s20, %s1717_s20, %s1718_s5  }
  0x16   :  { %1697 = dma.done.wait [#allocation3], 512  }
  0x17   :  { %1698 = vsyncadd [#allocation3], 4294966784 }
  0x18   :  { %1699 = dma.done.wait [#allocation6], 2336  }
  0x19   :  { %1700 = vsyncadd [#allocation6], 4294964960 }
  0x1a   :  { %1701 = dma.done.wait [#allocation9], 8192  }
  0x1b   :  { %1702 = vsyncadd [#allocation9], 4294959104 }
  0x1c   :  { %1703 = dma.done.wait [#allocation12], 2048  }
  0x1d   :  { %1704 = vsyncadd [#allocation12], 4294965248  ;;  %v1076_v0 = vld [vmem:[#allocation5 + $0x70] sm:$0xf]  ;;  %v1427_v1 = vld [vmem:[#allocation5 + $0x74] sm:$0xf0] }
  0x1e   :  { %v1426_v2 = vld [vmem:[#allocation5 + $0x74] sm:$0xf]  ;;  %v1077_v3 = vor.u32 %v1427_v1, %v1076_v0  ;;  %v1078_v4 = vld [vmem:[#allocation5 + $0x78] sm:$0xf0]  ;;  %v1068_v5 = vld [vmem:[#allocation5 + $0x60] sm:$0xf] }
  0x1f   :  { %v1425_v6 = vld [vmem:[#allocation5 + $0x64] sm:$0xf0]  ;;  %v1081_v7 = vor.u32 %v1426_v2, %v1078_v4  ;;  %v1424_v8 = vld [vmem:[#allocation5 + $0x64] sm:$0xf]  ;;  %v1070_v9 = vld [vmem:[#allocation5 + $0x68] sm:$0xf0] }
  0x20   :  { %250 = vmatpush.bf16.msra.mxu0 %v1077_v3  ;;  %v1069_v10 = vor.u32 %v1425_v6, %v1068_v5  ;;  %v1073_v11 = vor.u32 %v1424_v8, %v1070_v9  ;;  %v1060_v12 = vld [vmem:[#allocation5 + $0x50] sm:$0xf]  ;;  %v1423_v13 = vld [vmem:[#allocation5 + $0x54] sm:$0xf0]  ;;  %v1422_v14 = vld [vmem:[#allocation5 + $0x54] sm:$0xf] }
  0x21   :  { %278 = vmatpush.bf16.msra.mxu2 %v1081_v7  ;;  %v1062_v15 = vld [vmem:[#allocation5 + $0x58] sm:$0xf0]  ;;  %v1061_v16 = vor.u32 %v1423_v13, %v1060_v12  ;;  %v1052_v17 = vld [vmem:[#allocation5 + $0x40] sm:$0xf]  ;;  %v1421_v19 = vld [vmem:[#allocation5 + $0x44] sm:$0xf0] }
  0x22   :  { %v1065_v18 = vor.u32 %v1422_v14, %v1062_v15  ;;  %v1428_v20 = vld [vmem:[#allocation5 + $0x84] sm:$0xf]  ;;  %v1086_v21 = vld [vmem:[#allocation5 + $0x88] sm:$0xf0]  ;;  %v129_v26 = vld [vmem:[#allocation2 + $0x18] sm:$0xff]  ;;  %v1053_v27 = vor.u32 %v1421_v19, %v1052_v17  ;;  %vm246_vm0 = vcmask 130048  }
  0x23   :  { %v1420_v22 = vld [vmem:[#allocation5 + $0x44] sm:$0xf]  ;;  %v1054_v23 = vld [vmem:[#allocation5 + $0x48] sm:$0xf0]  ;;  %v1089_v24 = vor.u32 %v1428_v20, %v1086_v21  ;;  %v1044_v28 = vld [vmem:[#allocation5 + $0x30] sm:$0xf] }
  0x24   :  { %251 = vmatpush.bf16.msra.mxu0 %v1069_v10  ;;  %v127_v25 = vld [vmem:[#allocation2 + $0x8] sm:$0xff]  ;;  %v1419_v29 = vld [vmem:[#allocation5 + $0x34] sm:$0xf0]  ;;  %v1057_v31 = vor.u32 %v1420_v22, %v1054_v23  ;;  %v1418_v32 = vld [vmem:[#allocation5 + $0x34] sm:$0xf]  ;;  %s1719_s1 = smov [#allocation13]  }
  0x25   :  { %279 = vmatpush.bf16.msra.mxu2 %v1073_v11  ;;  %299 = vmatpush.bf16.msra.mxu3 %v1089_v24  ;;  %v131_v30 = vpack.c.bf16 %v129_v26, %v127_v25  ;;  %v1084_v33 = vld [vmem:[#allocation5 + $0x80] sm:$0xf]  ;;  %v1429_v34 = vld [vmem:[#allocation5 + $0x84] sm:$0xf0]  ;;  %v1046_v35 = vld [vmem:[#allocation5 + $0x38] sm:$0xf0]  ;;  %v1045_v41 = vor.u32 %v1419_v29, %v1044_v28 }
  0x26   :  { %v1085_v36 = vor.u32 %v1429_v34, %v1084_v33  ;;  %v1150_v37 = vld [vmem:[#allocation8 + $0x70] sm:$0xf]  ;;  %v1445_v38 = vld [vmem:[#allocation8 + $0x74] sm:$0xf0]  ;;  %v1142_v40 = vld [vmem:[#allocation8 + $0x60] sm:$0xf]  ;;  %v1049_v45 = vor.u32 %v1418_v32, %v1046_v35 }
  0x27   :  { %v1151_v39 = vor.u32 %v1445_v38, %v1150_v37  ;;  %v1036_v42 = vld [vmem:[#allocation5 + $0x20] sm:$0xf]  ;;  %v1417_v43 = vld [vmem:[#allocation5 + $0x24] sm:$0xf0]  ;;  %v1443_v44 = vld [vmem:[#allocation8 + $0x64] sm:$0xf0] }
  0x28   :  { %252 = vmatpush.bf16.msra.mxu0 %v1061_v16  ;;  %1091 = vmatmul.msk.bf16.vlgmr.msra.gmra.mxu3 %vm246_vm0, %v131_v30  ;;  %v1416_v46 = vld [vmem:[#allocation5 + $0x24] sm:$0xf]  ;;  %v1143_v47 = vor.u32 %v1443_v44, %v1142_v40  ;;  %v1461_v49 = vld [vmem:[#allocation8 + $0xf4] sm:$0xf0]  ;;  %v1206_v54 = vld [vmem:[#allocation8 + $0xe0] sm:$0xf]  ;;  %v1037_v55 = vor.u32 %v1417_v43, %v1036_v42 }
  0x29   :  { %280 = vmatpush.bf16.msra.mxu2 %v1065_v18  ;;  %271 = vmatpush.bf16.msra.mxu1 %v1085_v36  ;;  %v1214_v48 = vld [vmem:[#allocation8 + $0xf0] sm:$0xf]  ;;  %v1038_v50 = vld [vmem:[#allocation5 + $0x28] sm:$0xf0]  ;;  %v1028_v56 = vld [vmem:[#allocation5 + $0x10] sm:$0xf] }
  0x2a   :  { %v1215_v51 = vor.u32 %v1461_v49, %v1214_v48  ;;  %v1134_v52 = vld [vmem:[#allocation8 + $0x50] sm:$0xf]  ;;  %v1441_v53 = vld [vmem:[#allocation8 + $0x54] sm:$0xf0]  ;;  %v1459_v57 = vld [vmem:[#allocation8 + $0xe4] sm:$0xf0]  ;;  %v1041_v58 = vor.u32 %v1416_v46, %v1038_v50 }
  0x2b   :  { %v1415_v59 = vld [vmem:[#allocation5 + $0x14] sm:$0xf0]  ;;  %v1414_v60 = vld [vmem:[#allocation5 + $0x14] sm:$0xf]  ;;  %v1030_v61 = vld [vmem:[#allocation5 + $0x18] sm:$0xf0]  ;;  %v1135_v62 = vor.u32 %v1441_v53, %v1134_v52  ;;  %v1207_v63 = vor.u32 %v1459_v57, %v1206_v54 }
  0x2c   :  { %253 = vmatpush.bf16.msra.mxu0 %v1053_v27  ;;  %1090 = vmatmul.msk.bf16.vlgmr.msra.gmra.mxu1 %vm246_vm0, %v131_v30  ;;  %v1126_v0 = vld [vmem:[#allocation8 + $0x40] sm:$0xf]  ;;  %v1439_v1 = vld [vmem:[#allocation8 + $0x44] sm:$0xf0]  ;;  %v1029_v2 = vor.u32 %v1415_v59, %v1028_v56  ;;  %v1033_v3 = vor.u32 %v1414_v60, %v1030_v61  ;;  %v1020_v4 = vld [vmem:[#allocation5] sm:$0xf] }
  0x2d   :  { %281 = vmatpush.bf16.msra.mxu2 %v1057_v31  ;;  %510 = vmatpush.bf16.msrb.mxu1 %v1151_v39  ;;  %v1413_v5 = vld [vmem:[#allocation5 + $0x4] sm:$0xf0]  ;;  %v1412_v6 = vld [vmem:[#allocation5 + $0x4] sm:$0xf]  ;;  %v1127_v7 = vor.u32 %v1439_v1, %v1126_v0  ;;  %v1022_v8 = vld [vmem:[#allocation5 + $0x8] sm:$0xf0] }
  0x2e   :  { %524 = vmatpush.bf16.msrb.mxu3 %v1215_v51  ;;  %v1444_v9 = vld [vmem:[#allocation8 + $0x74] sm:$0xf]  ;;  %v1152_v10 = vld [vmem:[#allocation8 + $0x78] sm:$0xf0]  ;;  %v1021_v13 = vor.u32 %v1413_v5, %v1020_v4  ;;  %v1025_v16 = vor.u32 %v1412_v6, %v1022_v8  ;;  %v1442_v18 = vld [vmem:[#allocation8 + $0x64] sm:$0xf] }
  0x2f   :  { %v1460_v11 = vld [vmem:[#allocation8 + $0xf4] sm:$0xf]  ;;  %v1216_v12 = vld [vmem:[#allocation8 + $0xf8] sm:$0xf0]  ;;  %v1155_v17 = vor.u32 %v1444_v9, %v1152_v10  ;;  %v1144_v19 = vld [vmem:[#allocation8 + $0x68] sm:$0xf0] }
  0x30   :  { %254 = vmatpush.bf16.msra.mxu0 %v1045_v41  ;;  %v126_v14 = vld [vmem:[#allocation2] sm:$0xff]  ;;  %v128_v15 = vld [vmem:[#allocation2 + $0x10] sm:$0xff]  ;;  %v1219_v20 = vor.u32 %v1460_v11, %v1216_v12  ;;  %v1147_v24 = vor.u32 %v1442_v18, %v1144_v19  ;;  %v1457_v33 = vld [vmem:[#allocation8 + $0xd4] sm:$0xf0]  ;;  %s1000_s22 = sshll.u32 %s1719_s1, 4  ;;  %s1002_s24 = sshll.u32 %s1826_s9, 4  ;;  %s1001_s22 = int_to_ptr.vmem [resolvable:$true] %s1000_s22  ;;  %s1003_s24 = int_to_ptr.hbm [resolvable:$true] %s1002_s24 }
  0x31   :  { %282 = vmatpush.bf16.msra.mxu2 %v1049_v45  ;;  %511 = vmatpush.bf16.msrb.mxu1 %v1143_v47  ;;  %v130_v21 = vpack.c.bf16 %v128_v15, %v126_v14  ;;  %v1458_v22 = vld [vmem:[#allocation8 + $0xe4] sm:$0xf]  ;;  %v1208_v23 = vld [vmem:[#allocation8 + $0xe8] sm:$0xf0]  ;;  %v1440_v25 = vld [vmem:[#allocation8 + $0x54] sm:$0xf] }
  0x32   :  { %525 = vmatpush.bf16.msrb.mxu3 %v1207_v63  ;;  %v1136_v26 = vld [vmem:[#allocation8 + $0x58] sm:$0xf0]  ;;  %v1211_v27 = vor.u32 %v1458_v22, %v1208_v23  ;;  %v1438_v29 = vld [vmem:[#allocation8 + $0x44] sm:$0xf]  ;;  %v1128_v30 = vld [vmem:[#allocation8 + $0x48] sm:$0xf0] }
  0x33   :  { %v1139_v28 = vor.u32 %v1440_v25, %v1136_v26  ;;  %v1131_v31 = vor.u32 %v1438_v29, %v1128_v30  ;;  %v1198_v32 = vld [vmem:[#allocation8 + $0xd0] sm:$0xf]  ;;  %v1456_v34 = vld [vmem:[#allocation8 + $0xd4] sm:$0xf]  ;;  %v1200_v36 = vld [vmem:[#allocation8 + $0xd8] sm:$0xf0] }
  0x34   :  { %255 = vmatpush.bf16.msra.mxu0 %v1037_v55  ;;  %v1199_v35 = vor.u32 %v1457_v33, %v1198_v32  ;;  %v1203_v37 = vor.u32 %v1456_v34, %v1200_v36  ;;  %v1118_v38 = vld [vmem:[#allocation8 + $0x30] sm:$0xf]  ;;  %v1437_v39 = vld [vmem:[#allocation8 + $0x34] sm:$0xf0]  ;;  %v1436_v40 = vld [vmem:[#allocation8 + $0x34] sm:$0xf] }
  0x35   :  { %283 = vmatpush.bf16.msra.mxu2 %v1041_v58  ;;  %512 = vmatpush.bf16.msrb.mxu1 %v1135_v62  ;;  %v1119_v41 = vor.u32 %v1437_v39, %v1118_v38  ;;  %v1120_v42 = vld [vmem:[#allocation8 + $0x38] sm:$0xf0]  ;;  %v1190_v44 = vld [vmem:[#allocation8 + $0xc0] sm:$0xf]  ;;  %v1455_v45 = vld [vmem:[#allocation8 + $0xc4] sm:$0xf0] }
  0x36   :  { %526 = vmatpush.bf16.msrb.mxu3 %v1199_v35  ;;  %v1123_v43 = vor.u32 %v1436_v40, %v1120_v42  ;;  %v1454_v46 = vld [vmem:[#allocation8 + $0xc4] sm:$0xf]  ;;  %v1191_v47 = vor.u32 %v1455_v45, %v1190_v44  ;;  %v1192_v48 = vld [vmem:[#allocation8 + $0xc8] sm:$0xf0]  ;;  %v1110_v50 = vld [vmem:[#allocation8 + $0x20] sm:$0xf] }
  0x37   :  { %v1195_v49 = vor.u32 %v1454_v46, %v1192_v48  ;;  %v1435_v51 = vld [vmem:[#allocation8 + $0x24] sm:$0xf0]  ;;  %v1434_v52 = vld [vmem:[#allocation8 + $0x24] sm:$0xf]  ;;  %v1112_v54 = vld [vmem:[#allocation8 + $0x28] sm:$0xf0] }
  0x38   :  { %256 = vmatpush.bf16.msra.mxu0 %v1029_v2  ;;  %v1111_v53 = vor.u32 %v1435_v51, %v1110_v50  ;;  %v1115_v55 = vor.u32 %v1434_v52, %v1112_v54  ;;  %v1182_v56 = vld [vmem:[#allocation8 + $0xb0] sm:$0xf]  ;;  %v1453_v57 = vld [vmem:[#allocation8 + $0xb4] sm:$0xf0]  ;;  %v1452_v58 = vld [vmem:[#allocation8 + $0xb4] sm:$0xf] }
  0x39   :  { %284 = vmatpush.bf16.msra.mxu2 %v1033_v3  ;;  %513 = vmatpush.bf16.msrb.mxu1 %v1127_v7  ;;  %v1183_v59 = vor.u32 %v1453_v57, %v1182_v56  ;;  %v1184_v60 = vld [vmem:[#allocation8 + $0xb8] sm:$0xf0]  ;;  %v1102_v62 = vld [vmem:[#allocation8 + $0x10] sm:$0xf]  ;;  %v1433_v63 = vld [vmem:[#allocation8 + $0x14] sm:$0xf0] }
  0x3a   :  { %527 = vmatpush.bf16.msrb.mxu3 %v1191_v47  ;;  %v1187_v61 = vor.u32 %v1452_v58, %v1184_v60  ;;  %v1432_v0 = vld [vmem:[#allocation8 + $0x14] sm:$0xf]  ;;  %v1103_v1 = vor.u32 %v1433_v63, %v1102_v62  ;;  %v1104_v2 = vld [vmem:[#allocation8 + $0x18] sm:$0xf0]  ;;  %v1174_v4 = vld [vmem:[#allocation8 + $0xa0] sm:$0xf] }
  0x3b   :  { %v1107_v3 = vor.u32 %v1432_v0, %v1104_v2  ;;  %v1451_v5 = vld [vmem:[#allocation8 + $0xa4] sm:$0xf0]  ;;  %v1450_v6 = vld [vmem:[#allocation8 + $0xa4] sm:$0xf]  ;;  %v1176_v8 = vld [vmem:[#allocation8 + $0xa8] sm:$0xf0] }
  0x3c   :  { %257 = vmatpush.bf16.msra.mxu0 %v1021_v13  ;;  %v1175_v7 = vor.u32 %v1451_v5, %v1174_v4  ;;  %v1179_v9 = vor.u32 %v1450_v6, %v1176_v8  ;;  %v1094_v10 = vld [vmem:[#allocation8] sm:$0xf]  ;;  %v1431_v11 = vld [vmem:[#allocation8 + $0x4] sm:$0xf0]  ;;  %v1430_v12 = vld [vmem:[#allocation8 + $0x4] sm:$0xf] }
  0x3d   :  { %285 = vmatpush.bf16.msra.mxu2 %v1025_v16  ;;  %514 = vmatpush.bf16.msrb.mxu1 %v1119_v41  ;;  %v1095_v13 = vor.u32 %v1431_v11, %v1094_v10  ;;  %v1096_v14 = vld [vmem:[#allocation8 + $0x8] sm:$0xf0]  ;;  %v1166_v16 = vld [vmem:[#allocation8 + $0x90] sm:$0xf]  ;;  %v1448_v18 = vld [vmem:[#allocation8 + $0x94] sm:$0xf] }
  0x3e   :  { %528 = vmatpush.bf16.msrb.mxu3 %v1183_v59  ;;  %v1099_v15 = vor.u32 %v1430_v12, %v1096_v14  ;;  %v1158_v22 = vld [vmem:[#allocation8 + $0x80] sm:$0xf]  ;;  %v1447_v23 = vld [vmem:[#allocation8 + $0x84] sm:$0xf0]  ;;  %v1160_v26 = vld [vmem:[#allocation8 + $0x88] sm:$0xf0] }
  0x3f   :  { %258 = vmatmul.bf16.vlgmr.msra.gmra.mxu0 %v130_v21  ;;  %v1159_v25 = vor.u32 %v1447_v23, %v1158_v22  ;;  %v1477_v29 = vld [vmem:[#allocation10 + $0x74] sm:$0xf0]  ;;  %v1342_v30 = vld [vmem:[#allocation10 + $0xf0] sm:$0xf]  ;;  %v1476_v33 = vld [vmem:[#allocation10 + $0x74] sm:$0xf] }
  0x40   :  { %538 = vmatpush.bf16.msrb.mxu0 %v1155_v17  ;;  %286 = vmatmul.bf16.vlgmr.msra.gmra.mxu2 %v130_v21  ;;  %v1449_v17 = vld [vmem:[#allocation8 + $0x94] sm:$0xf0]  ;;  %v1280_v34 = vld [vmem:[#allocation10 + $0x78] sm:$0xf0]  ;;  %v1475_v2 = vld [vmem:[#allocation10 + $0x64] sm:$0xf0] }
  0x41   :  { %552 = vmatpush.bf16.msrb.mxu2 %v1219_v20  ;;  %515 = vmatpush.bf16.msrb.mxu1 %v1111_v53  ;;  %v1167_v19 = vor.u32 %v1449_v17, %v1166_v16  ;;  %v1168_v20 = vld [vmem:[#allocation8 + $0x98] sm:$0xf0]  ;;  %v1493_v32 = vld [vmem:[#allocation10 + $0xf4] sm:$0xf0]  ;;  %v1283_v36 = vor.u32 %v1476_v33, %v1280_v34  ;;  %v1491_v5 = vld [vmem:[#allocation10 + $0xe4] sm:$0xf0] }
  0x42   :  { %529 = vmatpush.bf16.msrb.mxu3 %v1175_v7  ;;  %v1171_v21 = vor.u32 %v1448_v18, %v1168_v20  ;;  %v1343_v35 = vor.u32 %v1493_v32, %v1342_v30  ;;  %v1344_v38 = vld [vmem:[#allocation10 + $0xf8] sm:$0xf0]  ;;  %v1474_v6 = vld [vmem:[#allocation10 + $0x64] sm:$0xf]  ;;  %v1272_v7 = vld [vmem:[#allocation10 + $0x68] sm:$0xf0] }
  0x43   :  { %v150_v40 = vld [vmem:[#allocation7] sm:$0x3]  ;;  %v1490_v10 = vld [vmem:[#allocation10 + $0xe4] sm:$0xf]  ;;  %v1336_v11 = vld [vmem:[#allocation10 + $0xe8] sm:$0xf0] }
  0x44   :  { %539 = vmatpush.bf16.msrb.mxu0 %v1147_v24  ;;  %v1446_v24 = vld [vmem:[#allocation8 + $0x84] sm:$0xf]  ;;  %v152_v42 = vperm.slane %v150_v40, 0  ;;  %v153_v48 = vperm.slane %v150_v40, 1  ;;  %v1339_v12 = vor.u32 %v1490_v10, %v1336_v11  ;;  %v1473_v14 = vld [vmem:[#allocation10 + $0x54] sm:$0xf0] }
  0x45   :  { %553 = vmatpush.bf16.msrb.mxu2 %v1211_v27  ;;  %516 = vmatpush.bf16.msrb.mxu1 %v1103_v1  ;;  %v1163_v27 = vor.u32 %v1446_v24, %v1160_v26  ;;  %v1270_v1 = vld [vmem:[#allocation10 + $0x60] sm:$0xf]  ;;  %v1326_v16 = vld [vmem:[#allocation10 + $0xd0] sm:$0xf]  ;;  %v1489_v17 = vld [vmem:[#allocation10 + $0xd4] sm:$0xf0] }
  0x46   :  { %530 = vmatpush.bf16.msrb.mxu3 %v1167_v19  ;;  %v1271_v4 = vor.u32 %v1475_v2, %v1270_v1  ;;  %v1472_v18 = vld [vmem:[#allocation10 + $0x54] sm:$0xf]  ;;  %v1327_v19 = vor.u32 %v1489_v17, %v1326_v16  ;;  %v1264_v20 = vld [vmem:[#allocation10 + $0x58] sm:$0xf0]  ;;  %v1471_v26 = vld [vmem:[#allocation10 + $0x44] sm:$0xf0] }
  0x47   :  { %v1328_v22 = vld [vmem:[#allocation10 + $0xd8] sm:$0xf0]  ;;  %v1267_v23 = vor.u32 %v1472_v18, %v1264_v20  ;;  %v1470_v30 = vld [vmem:[#allocation10 + $0x44] sm:$0xf]  ;;  %v1481_v1 = vld [vmem:[#allocation10 + $0x94] sm:$0xf0] }
  0x48   :  { %540 = vmatpush.bf16.msrb.mxu0 %v1139_v28  ;;  %v1278_v28 = vld [vmem:[#allocation10 + $0x70] sm:$0xf]  ;;  %v1486_v34 = vld [vmem:[#allocation10 + $0xc4] sm:$0xf]  ;;  %v1464_v2 = vld [vmem:[#allocation10 + $0x14] sm:$0xf] }
  0x49   :  { %554 = vmatpush.bf16.msrb.mxu2 %v1203_v37  ;;  %517 = vmatpush.bf16.msrb.mxu1 %v1095_v13  ;;  %v1492_v37 = vld [vmem:[#allocation10 + $0xf4] sm:$0xf]  ;;  %v1262_v13 = vld [vmem:[#allocation10 + $0x50] sm:$0xf]  ;;  %v1463_v10 = vld [vmem:[#allocation10 + $0x4] sm:$0xf0] }
  0x4a   :  { %531 = vmatpush.bf16.msrb.mxu3 %v1159_v25  ;;  %v1347_v39 = vor.u32 %v1492_v37, %v1344_v38  ;;  %v1254_v25 = vld [vmem:[#allocation10 + $0x40] sm:$0xf]  ;;  %v1246_v37 = vld [vmem:[#allocation10 + $0x30] sm:$0xf]  ;;  %v1469_v38 = vld [vmem:[#allocation10 + $0x34] sm:$0xf0] }
  0x4b   :  { %v1247_v40 = vor.u32 %v1469_v38, %v1246_v37  ;;  %v1286_v11 = vld [vmem:[#allocation10 + $0x80] sm:$0xf]  ;;  %v1478_v18 = vld [vmem:[#allocation10 + $0x84] sm:$0xf] }
  0x4c   :  { %541 = vmatpush.bf16.msrb.mxu0 %v1131_v31  ;;  %v1279_v31 = vor.u32 %v1477_v29, %v1278_v28  ;;  %v1255_v28 = vor.u32 %v1471_v26, %v1254_v25  ;;  %v1487_v29 = vld [vmem:[#allocation10 + $0xc4] sm:$0xf0] }
  0x4d   :  { %555 = vmatpush.bf16.msrb.mxu2 %v1195_v49  ;;  %v1499_v25 = vld [vmem:[#allocation11 + $0x28] sm:$0xff] }
  0x4e   :  { %770 = vmatpush.bf16.msra.mxu1 %v1279_v31  ;;  %784 = vmatpush.bf16.msra.mxu3 %v1343_v35  ;;  %v1256_v31 = vld [vmem:[#allocation10 + $0x48] sm:$0xf0] }
  0x4f   :  { %v1259_v33 = vor.u32 %v1470_v30, %v1256_v31  ;;  %v1320_v35 = vld [vmem:[#allocation10 + $0xc8] sm:$0xf0] }
  0x50   :  { %542 = vmatpush.bf16.msrb.mxu0 %v1123_v43  ;;  %v1507_v26 = vld [vmem:[#allocation11 + $0x68] sm:$0xff] }
  0x51   :  { %556 = vmatpush.bf16.msrb.mxu2 %v1187_v61 }
  0x52   :  { %771 = vmatpush.bf16.msra.mxu1 %v1271_v4 }
  0x54   :  { %543 = vmatpush.bf16.msrb.mxu0 %v1115_v55 }
  0x55   :  { %557 = vmatpush.bf16.msrb.mxu2 %v1179_v9  ;;  %v1275_v9 = vor.u32 %v1474_v6, %v1272_v7  ;;  %v1480_v6 = vld [vmem:[#allocation10 + $0x94] sm:$0xf]  ;;  %v1296_v7 = vld [vmem:[#allocation10 + $0x98] sm:$0xf0] }
  0x58   :  { %544 = vmatpush.bf16.msrb.mxu0 %v1107_v3  ;;  %v1334_v3 = vld [vmem:[#allocation10 + $0xe0] sm:$0xf] }
  0x59   :  { %558 = vmatpush.bf16.msrb.mxu2 %v1171_v21  ;;  %v1335_v8 = vor.u32 %v1491_v5, %v1334_v3  ;;  %v1488_v21 = vld [vmem:[#allocation10 + $0xd4] sm:$0xf]  ;;  %v1232_v3 = vld [vmem:[#allocation10 + $0x18] sm:$0xf0] }
  0x5a   :  { %v1331_v24 = vor.u32 %v1488_v21, %v1328_v22  ;;  %v1235_v5 = vor.u32 %v1464_v2, %v1232_v3  ;;  %v1501_v21 = vld [vmem:[#allocation11 + $0x38] sm:$0xff] }
  0x5b   :  { %785 = vmatpush.bf16.msra.mxu3 %v1335_v8  ;;  %v1299_v8 = vor.u32 %v1480_v6, %v1296_v7  ;;  %v1509_v22 = vld [vmem:[#allocation11 + $0x78] sm:$0xff] }
  0x5c   :  { %545 = vmatpush.bf16.msrb.mxu0 %v1099_v15  ;;  %v1263_v15 = vor.u32 %v1473_v14, %v1262_v13  ;;  %v1479_v13 = vld [vmem:[#allocation10 + $0x84] sm:$0xf0]  ;;  %v1462_v14 = vld [vmem:[#allocation10 + $0x4] sm:$0xf] }
  0x5d   :  { %559 = vmatpush.bf16.msrb.mxu2 %v1163_v27  ;;  %v1318_v27 = vld [vmem:[#allocation10 + $0xc0] sm:$0xf]  ;;  %v1287_v16 = vor.u32 %v1479_v13, %v1286_v11 }
  0x5e   :  { %772 = vmatpush.bf16.msra.mxu1 %v1263_v15  ;;  %v1319_v32 = vor.u32 %v1487_v29, %v1318_v27  ;;  %v1224_v15 = vld [vmem:[#allocation10 + $0x8] sm:$0xf0] }
  0x5f   :  { %786 = vmatpush.bf16.msra.mxu3 %v1327_v19  ;;  %v1227_v17 = vor.u32 %v1462_v14, %v1224_v15  ;;  %v1288_v19 = vld [vmem:[#allocation10 + $0x88] sm:$0xf0] }
  0x60   :  { %798 = vmatpush.bf16.msra.mxu0 %v1283_v36  ;;  %v1323_v36 = vor.u32 %v1486_v34, %v1320_v35  ;;  %v1291_v20 = vor.u32 %v1478_v18, %v1288_v19  ;;  %v344_v29 = vld [vmem:[%s1821_s4] sm:$0x3] }
  0x61   :  { %812 = vmatpush.bf16.msra.mxu2 %v1347_v39  ;;  %v1310_v39 = vld [vmem:[#allocation10 + $0xb0] sm:$0xf] }
  0x62   :  { %773 = vmatpush.bf16.msra.mxu1 %v1255_v28 }
  0x63   :  { %787 = vmatpush.bf16.msra.mxu3 %v1319_v32  ;;  %v346_v32 = vperm.slane %v344_v29, 0 }
  0x64   :  { %799 = vmatpush.bf16.msra.mxu0 %v1275_v9  ;;  %v1222_v9 = vld [vmem:[#allocation10] sm:$0xf] }
  0x65   :  { %813 = vmatpush.bf16.msra.mxu2 %v1339_v12  ;;  %v1223_v12 = vor.u32 %v1463_v10, %v1222_v9 }
  0x66   :  { %774 = vmatpush.bf16.msra.mxu1 %v1247_v40 }
  0x68   :  { %800 = vmatpush.bf16.msra.mxu0 %v1267_v23  ;;  %v1500_v23 = vld [vmem:[#allocation11 + $0x30] sm:$0xff] }
  0x69   :  { %814 = vmatpush.bf16.msra.mxu2 %v1331_v24  ;;  %v1508_v24 = vld [vmem:[#allocation11 + $0x70] sm:$0xff] }
  0x6c   :  { %801 = vmatpush.bf16.msra.mxu0 %v1259_v33  ;;  %v347_v33 = vperm.slane %v344_v29, 1 }
  0x6d   :  { %815 = vmatpush.bf16.msra.mxu2 %v1323_v36 }
  0xa9   :  { %v273_v41 = vpop.f32.mrf.mxu1 }
  0xab   :  { %v301_v45 = vpop.f32.mrf.mxu3 }
  0xb1   :  { %v275_v50 = vpop.f32.mrf.mxu1 }
  0xb3   :  { %v303_v60 = vpop.f32.mrf.mxu3 }
  0xbc   :  { %v259_v43 = vpop.f32.mrf.mxu0 }
  0xbd   :  { %v260_v44 = vadd.f32 %v259_v43, %v152_v42  ;;  %v1248_v43 = vld [vmem:[#allocation10 + $0x38] sm:$0xf0] }
  0xbf   :  { %v274_v46 = vadd.f32 %v273_v41, %v260_v44  ;;  %v1485_v41 = vld [vmem:[#allocation10 + $0xb4] sm:$0xf0] }
  0xc0   :  { %v1311_v44 = vor.u32 %v1485_v41, %v1310_v39 }
  0xc1   :  { %v306_v52 = vmax.f32 %v274_v46, 0.0  ;;  %v1484_v46 = vld [vmem:[#allocation10 + $0xb4] sm:$0xf] }
  0xc2   :  { %788 = vmatpush.bf16.msra.mxu3 %v1311_v44 }
  0xc3   :  { %v287_v47 = vpop.f32.mrf.mxu2 }
  0xc4   :  { %v261_v49 = vpop.f32.mrf.mxu0  ;;  %v288_v54 = vadd.f32 %v287_v47, %v153_v48  ;;  %v1312_v47 = vld [vmem:[#allocation10 + $0xb8] sm:$0xf0] }
  0xc5   :  { %v262_v51 = vadd.f32 %v261_v49, %v152_v42  ;;  %v1468_v42 = vld [vmem:[#allocation10 + $0x34] sm:$0xf]  ;;  %v1238_v49 = vld [vmem:[#allocation10 + $0x20] sm:$0xf] }
  0xc6   :  { %v302_v58 = vadd.f32 %v301_v45, %v288_v54  ;;  %v1251_v45 = vor.u32 %v1468_v42, %v1248_v43  ;;  %v1466_v54 = vld [vmem:[#allocation10 + $0x24] sm:$0xf] }
  0xc7   :  { %v276_v53 = vadd.f32 %v275_v50, %v262_v51  ;;  %v1467_v50 = vld [vmem:[#allocation10 + $0x24] sm:$0xf0]  ;;  %v1302_v51 = vld [vmem:[#allocation10 + $0xa0] sm:$0xf] }
  0xc8   :  { %v307_v62 = vmax.f32 %v302_v58, 0.0  ;;  %802 = vmatpush.bf16.msra.mxu0 %v1251_v45  ;;  %v1482_v58 = vld [vmem:[#allocation10 + $0xa4] sm:$0xf] }
  0xc9   :  { %v308_v55 = vmax.f32 %v276_v53, 0.0  ;;  %v1483_v53 = vld [vmem:[#allocation10 + $0xa4] sm:$0xf0] }
  0xcb   :  { %v310_v56 = vpack.c.bf16 %v308_v55, %v306_v52  ;;  %v289_v57 = vpop.f32.mrf.mxu2  ;;  %v1239_v52 = vor.u32 %v1467_v50, %v1238_v49  ;;  %v1240_v55 = vld [vmem:[#allocation10 + $0x28] sm:$0xf0] }
  0xcc   :  { %v290_v59 = vadd.f32 %v289_v57, %v153_v48  ;;  %v1315_v48 = vor.u32 %v1484_v46, %v1312_v47  ;;  %v1243_v57 = vor.u32 %v1466_v54, %v1240_v55  ;;  %v1497_v54 = vld [vmem:[#allocation11 + $0x18] sm:$0xff] }
  0xcd   :  { %518 = vmatmul.bf16.vlgmr.msrb.gmra.mxu1 %v310_v56  ;;  %546 = vmatmul.bf16.vlgmr.msrb.gmra.mxu0 %v310_v56  ;;  %v1303_v56 = vor.u32 %v1483_v53, %v1302_v51  ;;  %v1506_v53 = vld [vmem:[#allocation11 + $0x60] sm:$0xff]  ;;  %v1505_v55 = vld [vmem:[#allocation11 + $0x58] sm:$0xff] }
  0xce   :  { %v304_v61 = vadd.f32 %v303_v60, %v290_v59  ;;  %816 = vmatpush.bf16.msra.mxu2 %v1315_v48  ;;  %v1304_v59 = vld [vmem:[#allocation10 + $0xa8] sm:$0xf0]  ;;  %775 = vmatpush.bf16.msra.mxu1 %v1239_v52  ;;  %v1498_v52 = vld [vmem:[#allocation11 + $0x20] sm:$0xff] }
  0xcf   :  { %v1307_v60 = vor.u32 %v1482_v58, %v1304_v59  ;;  %789 = vmatpush.bf16.msra.mxu3 %v1303_v56  ;;  %803 = vmatpush.bf16.msra.mxu0 %v1243_v57  ;;  %v1496_v56 = vld [vmem:[#allocation11 + $0x10] sm:$0xff]  ;;  %v1495_v58 = vld [vmem:[#allocation11 + $0x8] sm:$0xff] }
  0xd0   :  { %v309_v63 = vmax.f32 %v304_v61, 0.0  ;;  %v1230_v61 = vld [vmem:[#allocation10 + $0x10] sm:$0xf]  ;;  %v1503_v59 = vld [vmem:[#allocation11 + $0x48] sm:$0xff] }
  0xd1   :  { %v1504_v57 = vld [vmem:[#allocation11 + $0x50] sm:$0xff] }
  0xd2   :  { %v311_v0 = vpack.c.bf16 %v309_v63, %v307_v62  ;;  %v1465_v62 = vld [vmem:[#allocation10 + $0x14] sm:$0xf0]  ;;  %v1294_v63 = vld [vmem:[#allocation10 + $0x90] sm:$0xf]  ;;  %817 = vmatpush.bf16.msra.mxu2 %v1307_v60  ;;  %v1494_v60 = vld [vmem:[#allocation11] sm:$0xff] }
  0xd3   :  { %v1295_v4 = vor.u32 %v1481_v1, %v1294_v63  ;;  %804 = vmatpush.bf16.msra.mxu0 %v1235_v5 }
  0xd4   :  { %532 = vmatmul.bf16.vlgmr.msrb.gmra.mxu3 %v311_v0  ;;  %560 = vmatmul.bf16.vlgmr.msrb.gmra.mxu2 %v311_v0  ;;  %v1231_v0 = vor.u32 %v1465_v62, %v1230_v61  ;;  %v1502_v61 = vld [vmem:[#allocation11 + $0x40] sm:$0xff] }
  0xd5   :  { %790 = vmatpush.bf16.msra.mxu3 %v1295_v4 }
  0xd6   :  { %776 = vmatpush.bf16.msra.mxu1 %v1231_v0  ;;  %818 = vmatpush.bf16.msra.mxu2 %v1299_v8  ;;  %v604_v0 = vld [vmem:[%s1823_s6] sm:$0x3] }
  0xd7   :  { %805 = vmatpush.bf16.msra.mxu0 %v1227_v17  ;;  %v606_v2 = vperm.slane %v604_v0, 0  ;;  %v607_v4 = vperm.slane %v604_v0, 1 }
  0xd9   :  { %791 = vmatpush.bf16.msra.mxu3 %v1287_v16 }
  0xda   :  { %777 = vmatpush.bf16.msra.mxu1 %v1223_v12  ;;  %819 = vmatpush.bf16.msra.mxu2 %v1291_v20 }
  0xdd   :  { %978 = vmatpush.bf16.msrb.mxu3 %v1509_v22 }
  0xde   :  { %964 = vmatpush.bf16.msrb.mxu1 %v1501_v21 }
  0xe1   :  { %979 = vmatpush.bf16.msrb.mxu3 %v1508_v24 }
  0xe2   :  { %965 = vmatpush.bf16.msrb.mxu1 %v1500_v23 }
  0xe5   :  { %980 = vmatpush.bf16.msrb.mxu3 %v1507_v26 }
  0xe6   :  { %966 = vmatpush.bf16.msrb.mxu1 %v1499_v25  ;;  %v1528_v25 = vld [vmem:[%s1825_s8] ss:$0 sm:$0xff] }
  0xe9   :  { %981 = vmatpush.bf16.msrb.mxu3 %v1506_v53 }
  0xea   :  { %967 = vmatpush.bf16.msrb.mxu1 %v1498_v52 }
  0xed   :  { %982 = vmatpush.bf16.msrb.mxu3 %v1505_v55 }
  0xee   :  { %968 = vmatpush.bf16.msrb.mxu1 %v1497_v54 }
  0xf1   :  { %983 = vmatpush.bf16.msrb.mxu3 %v1504_v57 }
  0xf2   :  { %969 = vmatpush.bf16.msrb.mxu1 %v1496_v56 }
  0xf5   :  { %984 = vmatpush.bf16.msrb.mxu3 %v1503_v59 }
  0xf6   :  { %970 = vmatpush.bf16.msrb.mxu1 %v1495_v58 }
  0xf9   :  { %985 = vmatpush.bf16.msrb.mxu3 %v1502_v61 }
  0xfa   :  { %971 = vmatpush.bf16.msrb.mxu1 %v1494_v60 }
 0x14a   :  { %v519_v27 = vpop.f32.mrf.mxu1  ;;  %v547_v28 = vpop.f32.mrf.mxu0 }
 0x14b   :  { %v520_v36 = vadd.f32 %v519_v27, %v346_v32  ;;  %v548_v37 = vadd.f32 %v547_v28, %v347_v33 }
 0x152   :  { %v521_v34 = vpop.f32.mrf.mxu1  ;;  %v549_v35 = vpop.f32.mrf.mxu0 }
 0x153   :  { %v522_v38 = vadd.f32 %v521_v34, %v346_v32  ;;  %v550_v39 = vadd.f32 %v549_v35, %v347_v33 }
 0x157   :  { %v533_v30 = vpop.f32.mrf.mxu3  ;;  %v561_v31 = vpop.f32.mrf.mxu2 }
 0x158   :  { %v534_v40 = vadd.f32 %v533_v30, %v520_v36  ;;  %v562_v41 = vadd.f32 %v561_v31, %v548_v37 }
 0x15a   :  { %v566_v46 = vmax.f32 %v534_v40, 0.0  ;;  %v567_v47 = vmax.f32 %v562_v41, 0.0 }
 0x15f   :  { %v535_v42 = vpop.f32.mrf.mxu3  ;;  %v563_v43 = vpop.f32.mrf.mxu2 }
 0x160   :  { %v536_v44 = vadd.f32 %v535_v42, %v522_v38  ;;  %v564_v45 = vadd.f32 %v563_v43, %v550_v39 }
 0x162   :  { %v568_v48 = vmax.f32 %v536_v44, 0.0  ;;  %v569_v49 = vmax.f32 %v564_v45, 0.0 }
 0x164   :  { %v570_v50 = vpack.c.bf16 %v568_v48, %v566_v46  ;;  %v571_v51 = vpack.c.bf16 %v569_v49, %v567_v47 }
 0x166   :  { %778 = vmatmul.bf16.vlgmr.msra.gmra.mxu1 %v570_v50  ;;  %792 = vmatmul.bf16.vlgmr.msra.gmra.mxu3 %v571_v51 }
 0x167   :  { %806 = vmatmul.bf16.vlgmr.msra.gmra.mxu0 %v570_v50  ;;  %820 = vmatmul.bf16.vlgmr.msra.gmra.mxu2 %v571_v51 }
 0x1e3   :  { %v779_v62 = vpop.f32.mrf.mxu1 }
 0x1e4   :  { %v807_v63 = vpop.f32.mrf.mxu0  ;;  %v780_v6 = vadd.f32 %v779_v62, %v606_v2 }
 0x1e5   :  { %v808_v8 = vadd.f32 %v807_v63, %v607_v4 }
 0x1e9   :  { %v793_v1 = vpop.f32.mrf.mxu3 }
 0x1ea   :  { %v821_v3 = vpop.f32.mrf.mxu2  ;;  %v794_v9 = vadd.f32 %v793_v1, %v780_v6 }
 0x1eb   :  { %v781_v5 = vpop.f32.mrf.mxu1  ;;  %v822_v11 = vadd.f32 %v821_v3, %v808_v8 }
 0x1ec   :  { %v809_v7 = vpop.f32.mrf.mxu0  ;;  %v782_v10 = vadd.f32 %v781_v5, %v606_v2  ;;  %v826_v17 = vmax.f32 %v794_v9, 0.0 }
 0x1ed   :  { %v810_v12 = vadd.f32 %v809_v7, %v607_v4  ;;  %v827_v19 = vmax.f32 %v822_v11, 0.0 }
 0x1f1   :  { %v795_v13 = vpop.f32.mrf.mxu3 }
 0x1f2   :  { %v796_v14 = vadd.f32 %v795_v13, %v782_v10  ;;  %v823_v15 = vpop.f32.mrf.mxu2 }
 0x1f3   :  { %v824_v16 = vadd.f32 %v823_v15, %v810_v12 }
 0x1f4   :  { %v828_v18 = vmax.f32 %v796_v14, 0.0 }
 0x1f5   :  { %v829_v20 = vmax.f32 %v824_v16, 0.0 }
 0x1f6   :  { %v830_v21 = vpack.c.bf16 %v828_v18, %v826_v17 }
 0x1f7   :  { %v831_v22 = vpack.c.bf16 %v829_v20, %v827_v19 }
 0x1f8   :  { %972 = vmatmul.bf16.vlgmr.msrb.gmra.mxu1 %v830_v21 }
 0x1f9   :  { %986 = vmatmul.bf16.vlgmr.msrb.gmra.mxu3 %v831_v22 }
 0x275   :  { %v973_v23 = vpop.f32.mrf.mxu1 }
 0x276   :  { %v974_v27 = vadd.f32 %v1528_v25, %v973_v23 }
 0x27c   :  { %v987_v24 = vpop.f32.mrf.mxu3 }
 0x27d   :  { %v975_v26 = vpop.f32.mrf.mxu1  ;;  %v988_v30 = vadd.f32 %v987_v24, %v974_v27 }
 0x27e   :  { %v976_v28 = vadd.f32 %v1528_v25, %v975_v26 }
 0x284   :  { %v989_v29 = vpop.f32.mrf.mxu3 }
 0x285   :  { %v990_v31 = vadd.f32 %v989_v29, %v976_v28 }
 0x287   :  { %v1513_v32 = vpack.c.bf16 %v990_v31, %v988_v30 }
 0x289   :  { %1514 = vst [vmem:[#allocation13] sm:$0xff] %v1513_v32  }
 0x28a   :  { %1008 = dma.vmem_to_hbm [thread:$0]  %s1001_s22, 128, %s1003_s24, [#allocation4], %s1717_s20, %s1717_s20, %s1718_s5  }
 0x28b   :  { %1705 = dma.done.wait [#allocation4], 128  }
 0x28c   :  { %1706 = vsyncadd [#allocation4], 4294967168 }
 0x28d   :  { %1013 = vsyncpa [#allocation3], 1 }
 0x28e   :  { %1014 = vsyncpa [#allocation6], 1 }
 0x28f   :  { %1015 = vsyncpa [#allocation9], 1 }
 0x290   :  { %1016 = vsyncpa [#allocation12], 1 }
 0x291   :  { %1017 = vsyncpa [#allocation4], 1 }

</bundles_post_ra>
